<compile_context>
chip_gen: v6e
topology: v6e:2x2x1
jax: 0.10.0
libtpu: 0.0.40
codegen_flags: <defaults>
</compile_context>

<pallas_src>
import functools

import jax
import jax.numpy as jnp
from jax.experimental import pallas as pl
from jax.experimental.pallas import tpu as pltpu


LANE = 128  # lane (last-dim) alignment -> unmasked stores, full MXU tiles


# ----------------------------- Pallas kernel -------------------------------

def _make_fused_kernel(num_hidden):
    """Builds the fused GCN forward kernel for a given hidden-layer count.

    Refs (all full-array VMEM blocks):
      a_ref     : [N, N]                 bf16
      h_ref     : [N, Din_p]             bf16
      w_in_ref  : [Din_p, Dh_p]          bf16
      b_in_ref  : [1, Dh_p]              f32
      w_hid_ref : [num_hidden, Dh_p, Dh_p]  bf16   (only if num_hidden > 0)
      b_hid_ref : [num_hidden, 1, Dh_p]     f32    (only if num_hidden > 0)
      w_out_ref : [Dh_p, Dout_p]         bf16
      b_out_ref : [1, Dout_p]            f32
      o_ref     : [N, Dout_p]            f32
    """

    def body(a_ref, h_ref, w_in_ref, b_in_ref, w_hid_ref, b_hid_ref,
             w_out_ref, b_out_ref, o_ref):
        def gcn_layer(y_bf16, w_bf16, b_f32):
            # HW = H @ W   (bf16 x bf16 -> f32 accumulate on MXU)
            hw = jnp.dot(y_bf16, w_bf16, preferred_element_type=jnp.float32)
            # A @ HW  (A read from VMEM per matmul; not pinned in vregs)
            z = jnp.dot(a_ref[...], hw.astype(jnp.bfloat16),
                        preferred_element_type=jnp.float32)
            return jnp.maximum(z + b_f32, 0.0)  # bias + ReLU in f32

        # input layer
        y = gcn_layer(h_ref[...], w_in_ref[...], b_in_ref[...])

        # hidden layers (static unroll; num_hidden is a compile-time const)
        for i in range(num_hidden):
            y = gcn_layer(y.astype(jnp.bfloat16), w_hid_ref[i], b_hid_ref[i])

        # dropout(0.2): identity in eval mode
        # output Linear, fused into the same kernel
        out = jnp.dot(y.astype(jnp.bfloat16), w_out_ref[...],
                      preferred_element_type=jnp.float32)
        o_ref[...] = out + b_out_ref[...]

    if num_hidden > 0:
        return body

    # No hidden layers -> kernel signature without the (unused) hid refs.
    def body_no_hidden(a_ref, h_ref, w_in_ref, b_in_ref,
                       w_out_ref, b_out_ref, o_ref):
        return body(a_ref, h_ref, w_in_ref, b_in_ref, None, None,
                    w_out_ref, b_out_ref, o_ref)

    return body_no_hidden


# ----------------------------- helpers / prep -------------------------------

def _round_up(x, m):
    return ((x + m - 1) // m) * m


def _pad2(x, rows, cols, dtype):
    x = jnp.asarray(x, dtype)
    r, c = x.shape
    return jnp.pad(x, ((0, rows - r), (0, cols - c)))


def _pad_bias(b, cols):
    b = jnp.asarray(b, jnp.float32)
    return jnp.pad(b, (0, cols - b.shape[0])).reshape(1, cols)


def _full_spec(shape):
    # Single block covering the whole array in VMEM (grid-less call).
    return pl.BlockSpec(shape, lambda: (0,) * len(shape))


def prepare_gcn_params(params, num_layers):
    """One-time weight prep (pad lane dims to 128, cast to bf16, stack).

    Hoisted out of the per-call path: only A and H change per forward call.
    Zero padding is exact (padded rows/cols of W contribute nothing).
    """
    Din, Dh = params["W_in"].shape
    Dout = params["W_out"].shape[1]
    num_hidden = num_layers - 1

    Din_p = _round_up(Din, LANE)
    Dh_p = _round_up(Dh, LANE)
    Dout_p = _round_up(Dout, LANE)

    prep = {
        "num_hidden": num_hidden,
        "dims": (Din, Dh, Dout),
        "padded_dims": (Din_p, Dh_p, Dout_p),
        "W_in": _pad2(params["W_in"], Din_p, Dh_p, jnp.bfloat16),
        "b_in": _pad_bias(params["b_in"], Dh_p),
        "W_out": _pad2(params["W_out"], Dh_p, Dout_p, jnp.bfloat16),
        "b_out": _pad_bias(params["b_out"], Dout_p),
    }
    if num_hidden > 0:
        prep["W_hid"] = jnp.stack(
            [_pad2(w, Dh_p, Dh_p, jnp.bfloat16) for w in params["W_hid"]])
        prep["b_hid"] = jnp.stack(
            [_pad_bias(b, Dh_p) for b in params["b_hid"]])
    return prep


# ----------------------------- forward --------------------------------------

def gcn_node_forward(prep, A, H):
    N, _ = H.shape
    num_hidden = prep["num_hidden"]
    Din_p, _, Dout_p = prep["padded_dims"]
    Dout = prep["dims"][2]

    # Per-call input prep: node dim N is NOT padded (full-array blocks are
    # exempt from the (8,128) rule; only lane dims need 128 alignment).
    A_b = jnp.asarray(A, jnp.bfloat16)              # [N, N]
    H_b = _pad2(H, N, Din_p, jnp.bfloat16)          # [N, Din_p]

    args = [A_b, H_b, prep["W_in"], prep["b_in"]]
    if num_hidden > 0:
        args += [prep["W_hid"], prep["b_hid"]]
    args += [prep["W_out"], prep["b_out"]]

    out_p = pl.pallas_call(
        _make_fused_kernel(num_hidden),
        out_shape=jax.ShapeDtypeStruct((N, Dout_p), jnp.float32),
        in_specs=[_full_spec(a.shape) for a in args],
        out_specs=_full_spec((N, Dout_p)),
        compiler_params=pltpu.CompilerParams(
            vmem_limit_bytes=32 * 1024 * 1024),  # safe on v5e/v6e/v7x
    )(*args)

    return out_p[:, :Dout]


# ----------------------------- parameter init -------------------------------

def init_gcn_node_params(key, input_dim, output_dim, hidden_dim, num_layers):
    """Deterministic parameter init mirroring the module's __init__ shapes."""
    params = {}
    k = key

    def nxt():
        nonlocal k
        k, sub = jax.random.split(k)
        return sub

    params["W_in"] = jax.random.normal(
        nxt(), (input_dim, hidden_dim), jnp.float32) * 0.1
    params["b_in"] = jnp.zeros((hidden_dim,), jnp.float32)

    params["W_hid"] = []
    params["b_hid"] = []
    for _ in range(num_layers - 1):
        params["W_hid"].append(
            jax.random.normal(nxt(), (hidden_dim, hidden_dim), jnp.float32) * 0.1)
        params["b_hid"].append(jnp.zeros((hidden_dim,), jnp.float32))

    params["W_out"] = jax.random.normal(
        nxt(), (hidden_dim, output_dim), jnp.float32) * 0.1
    params["b_out"] = jnp.zeros((output_dim,), jnp.float32)
    return params


# ----------------------------- main ------------------------------------------

if __name__ == "__main__":
    N = 16            # number of nodes
    input_dim = 8     # node attribute length
    hidden_dim = 32
    output_dim = 7    # number of labels
    num_layers = 3

    key = jax.random.PRNGKey(0)
    k_a, k_h, k_p = jax.random.split(key, 3)

    # Deterministic symmetric adjacency with self-loops, row-normalized.
    raw = jax.random.uniform(k_a, (N, N), jnp.float32)
    adj = (raw + raw.T) * 0.5
    adj = (adj > 0.5).astype(jnp.float32) + jnp.eye(N, dtype=jnp.float32)
    deg = jnp.sum(adj, axis=1, keepdims=True)
    A = adj / deg

    H = jax.random.normal(k_h, (N, input_dim), jnp.float32)

    params = init_gcn_node_params(k_p, input_dim, output_dim,
                                  hidden_dim, num_layers)

    # One-time weight prep (hoisted out of the per-call path).
    prep = prepare_gcn_params(params, num_layers)

    out = gcn_node_forward(prep, A, H)
    out = jax.block_until_ready(out)

    assert out.shape == (N, output_dim), out.shape
    assert out.dtype == jnp.float32

    # bf16-matched pure-JAX reference (same casts as the kernel)
    def ref_forward(params, A, H):
        bf = jnp.bfloat16

        def layer(a, y, w, b):
            hw = jnp.dot(y.astype(bf), w.astype(bf),
                         preferred_element_type=jnp.float32)
            z = jnp.dot(a.astype(bf), hw.astype(bf),
                        preferred_element_type=jnp.float32)
            return jnp.maximum(z + b, 0.0)

        y = layer(A, H, params["W_in"], params["b_in"])
        for i in range(num_layers - 1):
            y = layer(A, y, params["W_hid"][i], params["b_hid"][i])
        out = jnp.dot(y.astype(bf), params["W_out"].astype(bf),
                      preferred_element_type=jnp.float32)
        return out + params["b_out"]

    ref = ref_forward(params, A, H)
    assert jnp.allclose(out, ref, atol=5e-3, rtol=5e-3), "mismatch vs reference"

    print("KERNEL_OK")
</pallas_src>

<mosaic_0001>
module attributes {stable_mosaic.version = 11 : i64} {
  func.func @body(%arg0: memref<16x16xbf16, #tpu.memory_space<vmem>>, %arg1: memref<16x128xbf16, #tpu.memory_space<vmem>>, %arg2: memref<128x128xbf16, #tpu.memory_space<vmem>>, %arg3: memref<1x128xf32, #tpu.memory_space<vmem>>, %arg4: memref<2x128x128xbf16, #tpu.memory_space<vmem>>, %arg5: memref<2x1x128xf32, #tpu.memory_space<vmem>>, %arg6: memref<128x128xbf16, #tpu.memory_space<vmem>>, %arg7: memref<1x128xf32, #tpu.memory_space<vmem>>, %arg8: memref<16x128xf32, #tpu.memory_space<vmem>>) attributes {dimension_semantics = [], scalar_prefetch = 0 : i64, scratch_operands = 0 : i64, tpu.core_type = #tpu.core_type<tc>} {
    %c0 = arith.constant 0 : index
    %c0_0 = arith.constant 0 : index
    %0 = vector.load %arg1[%c0, %c0_0] : memref<16x128xbf16, #tpu.memory_space<vmem>>, vector<16x128xbf16>
    %c0_1 = arith.constant 0 : index
    %c0_2 = arith.constant 0 : index
    %1 = vector.load %arg2[%c0_1, %c0_2] : memref<128x128xbf16, #tpu.memory_space<vmem>>, vector<128x128xbf16>
    %c0_3 = arith.constant 0 : index
    %c0_4 = arith.constant 0 : index
    %2 = vector.load %arg3[%c0_3, %c0_4] : memref<1x128xf32, #tpu.memory_space<vmem>>, vector<1x128xf32>
    %cst = arith.constant dense<0.000000e+00> : vector<16x128xf32>
    %3 = tpu.matmul %0, %1, %cst {dimension_numbers = #tpu.dot_dimension_numbers<[1], [0], [0], [1], [0, 0, 1, 1], [], []>} : vector<16x128xbf16>, vector<128x128xbf16>, vector<16x128xf32> -> vector<16x128xf32>
    %c0_5 = arith.constant 0 : index
    %c0_6 = arith.constant 0 : index
    %4 = vector.load %arg0[%c0_5, %c0_6] : memref<16x16xbf16, #tpu.memory_space<vmem>>, vector<16x16xbf16>
    %5 = arith.truncf %3 : vector<16x128xf32> to vector<16x128xbf16>
    %cst_7 = arith.constant dense<0.000000e+00> : vector<16x128xf32>
    %6 = tpu.matmul %4, %5, %cst_7 {dimension_numbers = #tpu.dot_dimension_numbers<[1], [0], [0], [1], [0, 0, 1, 1], [], []>} : vector<16x16xbf16>, vector<16x128xbf16>, vector<16x128xf32> -> vector<16x128xf32>
    %7 = vector.broadcast %2 : vector<1x128xf32> to vector<16x128xf32>
    %8 = arith.addf %6, %7 : vector<16x128xf32>
    %cst_8 = arith.constant 0.000000e+00 : f32
    %9 = vector.broadcast %cst_8 : f32 to vector<16x128xf32>
    %10 = arith.maximumf %8, %9 : vector<16x128xf32>
    %11 = arith.truncf %10 : vector<16x128xf32> to vector<16x128xbf16>
    %c0_9 = arith.constant 0 : index
    %c0_10 = arith.constant 0 : index
    %c0_11 = arith.constant 0 : index
    %12 = vector.load %arg4[%c0_9, %c0_10, %c0_11] : memref<2x128x128xbf16, #tpu.memory_space<vmem>>, vector<1x128x128xbf16>
    %13 = vector.shape_cast %12 : vector<1x128x128xbf16> to vector<128x128xbf16>
    %c0_12 = arith.constant 0 : index
    %c0_13 = arith.constant 0 : index
    %c0_14 = arith.constant 0 : index
    %14 = vector.load %arg5[%c0_12, %c0_13, %c0_14] : memref<2x1x128xf32, #tpu.memory_space<vmem>>, vector<1x1x128xf32>
    %15 = vector.shape_cast %14 : vector<1x1x128xf32> to vector<1x128xf32>
    %cst_15 = arith.constant dense<0.000000e+00> : vector<16x128xf32>
    %16 = tpu.matmul %11, %13, %cst_15 {dimension_numbers = #tpu.dot_dimension_numbers<[1], [0], [0], [1], [0, 0, 1, 1], [], []>} : vector<16x128xbf16>, vector<128x128xbf16>, vector<16x128xf32> -> vector<16x128xf32>
    %c0_16 = arith.constant 0 : index
    %c0_17 = arith.constant 0 : index
    %17 = vector.load %arg0[%c0_16, %c0_17] : memref<16x16xbf16, #tpu.memory_space<vmem>>, vector<16x16xbf16>
    %18 = arith.truncf %16 : vector<16x128xf32> to vector<16x128xbf16>
    %cst_18 = arith.constant dense<0.000000e+00> : vector<16x128xf32>
    %19 = tpu.matmul %17, %18, %cst_18 {dimension_numbers = #tpu.dot_dimension_numbers<[1], [0], [0], [1], [0, 0, 1, 1], [], []>} : vector<16x16xbf16>, vector<16x128xbf16>, vector<16x128xf32> -> vector<16x128xf32>
    %20 = vector.broadcast %15 : vector<1x128xf32> to vector<16x128xf32>
    %21 = arith.addf %19, %20 : vector<16x128xf32>
    %cst_19 = arith.constant 0.000000e+00 : f32
    %22 = vector.broadcast %cst_19 : f32 to vector<16x128xf32>
    %23 = arith.maximumf %21, %22 : vector<16x128xf32>
    %24 = arith.truncf %23 : vector<16x128xf32> to vector<16x128xbf16>
    %c1 = arith.constant 1 : index
    %c0_20 = arith.constant 0 : index
    %c0_21 = arith.constant 0 : index
    %25 = vector.load %arg4[%c1, %c0_20, %c0_21] : memref<2x128x128xbf16, #tpu.memory_space<vmem>>, vector<1x128x128xbf16>
    %26 = vector.shape_cast %25 : vector<1x128x128xbf16> to vector<128x128xbf16>
    %c1_22 = arith.constant 1 : index
    %c0_23 = arith.constant 0 : index
    %c0_24 = arith.constant 0 : index
    %27 = vector.load %arg5[%c1_22, %c0_23, %c0_24] : memref<2x1x128xf32, #tpu.memory_space<vmem>>, vector<1x1x128xf32>
    %28 = vector.shape_cast %27 : vector<1x1x128xf32> to vector<1x128xf32>
    %cst_25 = arith.constant dense<0.000000e+00> : vector<16x128xf32>
    %29 = tpu.matmul %24, %26, %cst_25 {dimension_numbers = #tpu.dot_dimension_numbers<[1], [0], [0], [1], [0, 0, 1, 1], [], []>} : vector<16x128xbf16>, vector<128x128xbf16>, vector<16x128xf32> -> vector<16x128xf32>
    %c0_26 = arith.constant 0 : index
    %c0_27 = arith.constant 0 : index
    %30 = vector.load %arg0[%c0_26, %c0_27] : memref<16x16xbf16, #tpu.memory_space<vmem>>, vector<16x16xbf16>
    %31 = arith.truncf %29 : vector<16x128xf32> to vector<16x128xbf16>
    %cst_28 = arith.constant dense<0.000000e+00> : vector<16x128xf32>
    %32 = tpu.matmul %30, %31, %cst_28 {dimension_numbers = #tpu.dot_dimension_numbers<[1], [0], [0], [1], [0, 0, 1, 1], [], []>} : vector<16x16xbf16>, vector<16x128xbf16>, vector<16x128xf32> -> vector<16x128xf32>
    %33 = vector.broadcast %28 : vector<1x128xf32> to vector<16x128xf32>
    %34 = arith.addf %32, %33 : vector<16x128xf32>
    %cst_29 = arith.constant 0.000000e+00 : f32
    %35 = vector.broadcast %cst_29 : f32 to vector<16x128xf32>
    %36 = arith.maximumf %34, %35 : vector<16x128xf32>
    %37 = arith.truncf %36 : vector<16x128xf32> to vector<16x128xbf16>
    %c0_30 = arith.constant 0 : index
    %c0_31 = arith.constant 0 : index
    %38 = vector.load %arg6[%c0_30, %c0_31] : memref<128x128xbf16, #tpu.memory_space<vmem>>, vector<128x128xbf16>
    %cst_32 = arith.constant dense<0.000000e+00> : vector<16x128xf32>
    %39 = tpu.matmul %37, %38, %cst_32 {dimension_numbers = #tpu.dot_dimension_numbers<[1], [0], [0], [1], [0, 0, 1, 1], [], []>} : vector<16x128xbf16>, vector<128x128xbf16>, vector<16x128xf32> -> vector<16x128xf32>
    %c0_33 = arith.constant 0 : index
    %c0_34 = arith.constant 0 : index
    %40 = vector.load %arg7[%c0_33, %c0_34] : memref<1x128xf32, #tpu.memory_space<vmem>>, vector<1x128xf32>
    %41 = vector.broadcast %40 : vector<1x128xf32> to vector<16x128xf32>
    %42 = arith.addf %39, %41 : vector<16x128xf32>
    %c0_35 = arith.constant 0 : index
    %c0_36 = arith.constant 0 : index
    %43 = vector.load %arg8[%c0_35, %c0_36] : memref<16x128xf32, #tpu.memory_space<vmem>>, vector<16x128xf32>
    tpu.vector_store %arg8[%c0_35, %c0_36], %42 {strides = array<i32>} : memref<16x128xf32, #tpu.memory_space<vmem>>, vector<16x128xf32>,
    return
  }
}

</mosaic_0001>

<bundles_post_ra>
// kernel: tpu_custom_call.1
= control target key start
LH: loop header
LB: loop body
LE: loop exit
PB: predicated region body
PF: predicated region fallthrough
CT: control target
= control target key end

     0   :  { %13 = vsyncpa [#allocation3], 0  ;;  %s1239_s0 = inlined_call_operand.hbm [shape: bf16[16,16], index: 0, kind: input, shape index: {}]   ;;  %s1240_s1 = inlined_call_operand.hbm [shape: bf16[16,128], index: 1, kind: input, shape index: {}]   ;;  %s1241_s2 = inlined_call_operand.hbm [shape: bf16[128,128], index: 2, kind: input, shape index: {}]   ;;  %s1242_s3 = inlined_call_operand.vmem [shape: f32[1,128], index: 3, kind: input, shape index: {}]   ;;  %s1243_s4 = inlined_call_operand.hbm [shape: bf16[2,128,128], index: 4, kind: input, shape index: {}]   ;;  %s1244_s5 = inlined_call_operand.vmem [shape: f32[2,1,128], index: 5, kind: input, shape index: {}]   ;;  %s1245_s6 = inlined_call_operand.hbm [shape: bf16[128,128], index: 6, kind: input, shape index: {}]   ;;  %s1246_s7 = inlined_call_operand.vmem [shape: f32[1,128], index: 7, kind: input, shape index: {}]   ;;  %s1247_s8 = inlined_call_operand.hbm [shape: f32[16,128], index: 8, kind: output, shape index: {}]  }
   0x1   :  { %14 = vsyncpa [#allocation6], 0 }
   0x2   :  { %15 = vsyncpa [#allocation9], 0 }
   0x3   :  { %16 = vsyncpa [#allocation4], 0  ;;  %s1080_s27 = smov [#allocation5]   ;;  %s1081_s29 = smov [#allocation8]  }
   0x4   :  { %s34_s28 = sshll.u32 %s1080_s27, 4  ;;  %s60_s30 = sshll.u32 %s1081_s29, 4  ;;  %s35_s28 = int_to_ptr.vmem [resolvable:$true] %s34_s28  ;;  %s61_s30 = int_to_ptr.vmem [resolvable:$true] %s60_s30 }
   0x5   :  { %s960_s9 = scalar_lea.vmem %s35_s28, 128  ;;  %p965_p1 = scmp.lt.s32.totalorder %s35_s28, %s35_s28 }
   0x6   :  { %p961_p0 = scmp.ne.s32.totalorder %s35_s28, %s960_s9  ;;  %p966_p2 = scmp.lt.s32.totalorder %s960_s9, %s960_s9 }
   0x8   :  { %p967_p3 = por %p966_p2, %p965_p1 }
   0xa   :  { %p968_p4 = pnand %p967_p3, %p961_p0 }
   0xc   :  { %971 = shalt.err (!%p968_p4)
}
   0xd   :  { %s1082_s10 = smov 64   ;;  %s1083_s11 = smov 4  }
   0xe   :  { %40 = dma.hbm_to_vmem [thread:$0]  %s1240_s1, 128, %s35_s28, [#allocation6], %s1082_s10, %s1082_s10, %s1083_s11  }
   0xf   :  { %s980_s14 = scalar_lea.vmem %s61_s30, 2048  ;;  %p985_p6 = scmp.lt.s32.totalorder %s61_s30, %s61_s30 }
  0x10   :  { %p981_p5 = scmp.ne.s32.totalorder %s61_s30, %s980_s14  ;;  %p986_p7 = scmp.lt.s32.totalorder %s980_s14, %s980_s14 }
  0x12   :  { %p987_p8 = por %p986_p7, %p985_p6 }
  0x14   :  { %p988_p9 = pnand %p987_p8, %p981_p5 }
  0x16   :  { %991 = shalt.err (!%p988_p9)
}
  0x17   :  { %66 = dma.hbm_to_vmem [thread:$0]  %s1243_s4, 2048, %s61_s30, [#allocation9], %s1082_s10, %s1082_s10, %s1083_s11  }
  0x18   :  { %s1084_s17 = smov [#allocation2]   ;;  %s1085_s19 = smov [#allocation7]  }
  0x19   :  { %s22_s18 = sshll.u32 %s1084_s17, 4  ;;  %s46_s20 = sshll.u32 %s1085_s19, 4  ;;  %s23_s18 = int_to_ptr.vmem [resolvable:$true] %s22_s18  ;;  %s47_s20 = int_to_ptr.vmem [resolvable:$true] %s46_s20 }
  0x1a   :  { %s1000_s1 = scalar_lea.vmem %s23_s18, 128  ;;  %p1005_p11 = scmp.lt.s32.totalorder %s23_s18, %s23_s18 }
  0x1b   :  { %p1001_p10 = scmp.ne.s32.totalorder %s23_s18, %s1000_s1  ;;  %p1006_p12 = scmp.lt.s32.totalorder %s1000_s1, %s1000_s1 }
  0x1d   :  { %p1007_p13 = por %p1006_p12, %p1005_p11 }
  0x1f   :  { %p1008_p0 = pnand %p1007_p13, %p1001_p10 }
  0x21   :  { %1011 = shalt.err (!%p1008_p0)
}
  0x22   :  { %28 = dma.hbm_to_vmem [thread:$0]  %s1239_s0, 128, %s23_s18, [#allocation3], %s1082_s10, %s1082_s10, %s1083_s11  }
  0x23   :  { %s1020_s4 = scalar_lea.vmem %s47_s20, 1024  ;;  %p1025_p2 = scmp.lt.s32.totalorder %s47_s20, %s47_s20 }
  0x24   :  { %p1021_p1 = scmp.ne.s32.totalorder %s47_s20, %s1020_s4  ;;  %p1026_p3 = scmp.lt.s32.totalorder %s1020_s4, %s1020_s4 }
  0x26   :  { %p1027_p4 = por %p1026_p3, %p1025_p2 }
  0x28   :  { %p1028_p5 = pnand %p1027_p4, %p1021_p1 }
  0x2a   :  { %1031 = shalt.err (!%p1028_p5)
}
  0x2b   :  { %52 = dma.hbm_to_vmem [thread:$0]  %s1241_s2, 1024, %s47_s20, [#allocation6], %s1082_s10, %s1082_s10, %s1083_s11  }
  0x2c   :  { %s1086_s25 = smov [#allocation10]  }
  0x2d   :  { %s74_s26 = sshll.u32 %s1086_s25, 4  ;;  %s75_s26 = int_to_ptr.vmem [resolvable:$true] %s74_s26 }
  0x2e   :  { %s1040_s27 = scalar_lea.vmem %s75_s26, 1024  ;;  %p1045_p7 = scmp.lt.s32.totalorder %s75_s26, %s75_s26 }
  0x2f   :  { %p1041_p6 = scmp.ne.s32.totalorder %s75_s26, %s1040_s27  ;;  %p1046_p8 = scmp.lt.s32.totalorder %s1040_s27, %s1040_s27 }
  0x31   :  { %p1047_p9 = por %p1046_p8, %p1045_p7 }
  0x33   :  { %p1048_p10 = pnand %p1047_p9, %p1041_p6 }
  0x35   :  { %1051 = shalt.err (!%p1048_p10)
}
  0x36   :  { %80 = dma.hbm_to_vmem [thread:$0]  %s1245_s6, 1024, %s75_s26, [#allocation9], %s1082_s10, %s1082_s10, %s1083_s11  }
  0x37   :  { %1072 = dma.done.wait [#allocation3], 128  }
  0x38   :  { %1073 = vsyncadd [#allocation3], 4294967168 }
  0x39   :  { %1074 = dma.done.wait [#allocation6], 1152  }
  0x3a   :  { %1075 = vsyncadd [#allocation6], 4294966144 }
  0x3b   :  { %1076 = dma.done.wait [#allocation9], 3072  }
  0x3c   :  { %1077 = vsyncadd [#allocation9], 4294964224  ;;  %v1087_v0 = vmov 0.0   ;;  %vm1088_vm0 = vmmov 0   ;;  %v918_v1 = vld [vmem:[#allocation7 + $0x38] sm:$0xff]   ;;  %v919_v2 = vld [vmem:[#allocation7 + $0x30] sm:$0xff]  }
  0x3d   :  { %808 = vmatprep.subr.bf16.mxu0 %v1087_v0  ;;  %824 = vmatprep.mubr.msk.bf16.mxu0 %vm1088_vm0, %v1087_v0  ;;  %v920_v3 = vld [vmem:[#allocation7 + $0x28] sm:$0xff]   ;;  %v921_v4 = vld [vmem:[#allocation7 + $0x20] sm:$0xff]   ;;  %v922_v5 = vld [vmem:[#allocation7 + $0x18] sm:$0xff]   ;;  %vm227_vm1 = vcmask 130048   ;;  %s1089_s12 = smov [#allocation11]  }
  0x3e   :  { %828 = vmatprep.subr.bf16.mxu1 %v1087_v0  ;;  %830 = vmatprep.mubr.msk.bf16.mxu1 %vm1088_vm0, %v1087_v0  ;;  %v923_v6 = vld [vmem:[#allocation7 + $0x10] sm:$0xff]   ;;  %v924_v7 = vld [vmem:[#allocation7 + $0x8] sm:$0xff]   ;;  %v925_v8 = vld [vmem:[#allocation7] sm:$0xff]   ;;  %s710_s13 = sshll.u32 %s1089_s12, 4  ;;  %s711_s13 = int_to_ptr.vmem [resolvable:$true] %s710_s13 }
  0x3f   :  { %809 = vmatpush3.bf16.msra.mxu0 %v918_v1  ;;  %v926_v9 = vld [vmem:[#allocation5] sm:$0xff]   ;;  %v1183_v15 = vld [vmem:[#allocation2] sm:$0xff]   ;;  %v930_v18 = vld [vmem:[#allocation8 + $0x28] sm:$0xff]   ;;  %p1057_p12 = scmp.lt.s32.totalorder %s711_s13, %s711_s13 }
  0x40   :  { %810 = vmatprep.subr.bf16.mxu0 %v1087_v0  ;;  %v928_v16 = vld [vmem:[#allocation8 + $0x38] sm:$0xff]   ;;  %v929_v17 = vld [vmem:[#allocation8 + $0x30] sm:$0xff]   ;;  %v931_v19 = vld [vmem:[#allocation8 + $0x20] sm:$0xff]  }
  0x41   :  { %v932_v20 = vld [vmem:[#allocation8 + $0x18] sm:$0xff]   ;;  %v933_v21 = vld [vmem:[#allocation8 + $0x10] sm:$0xff]   ;;  %v934_v22 = vld [vmem:[#allocation8 + $0x8] sm:$0xff]  }
  0x42   :  { %v935_v23 = vld [vmem:[#allocation8] sm:$0xff]   ;;  %v733_v24 = vld [vmem:[%s1242_s3] ss:$0 sm:$0xff]  ;;  %v936_v39 = vld [vmem:[#allocation8 + $0x78] sm:$0xff]  }
  0x43   :  { %811 = vmatpush3.bf16.msra.mxu0 %v919_v2  ;;  %v937_v40 = vld [vmem:[#allocation8 + $0x70] sm:$0xff]   ;;  %v938_v41 = vld [vmem:[#allocation8 + $0x68] sm:$0xff]   ;;  %v939_v42 = vld [vmem:[#allocation8 + $0x60] sm:$0xff]  }
  0x44   :  { %812 = vmatprep.subr.bf16.mxu0 %v1087_v0  ;;  %v940_v43 = vld [vmem:[#allocation8 + $0x58] sm:$0xff]   ;;  %v941_v44 = vld [vmem:[#allocation8 + $0x50] sm:$0xff]   ;;  %v942_v45 = vld [vmem:[#allocation8 + $0x48] sm:$0xff]  }
  0x45   :  { %v943_v46 = vld [vmem:[#allocation8 + $0x40] sm:$0xff]   ;;  %v744_v47 = vld [vmem:[%s1244_s5] ss:$0 sm:$0xff]  ;;  %v944_v62 = vld [vmem:[#allocation10 + $0x38] sm:$0xff]  }
  0x46   :  { %v945_v63 = vld [vmem:[#allocation10 + $0x30] sm:$0xff]   ;;  %v946_v1 = vld [vmem:[#allocation10 + $0x28] sm:$0xff]   ;;  %v947_v2 = vld [vmem:[#allocation10 + $0x20] sm:$0xff]  }
  0x47   :  { %813 = vmatpush3.bf16.msra.mxu0 %v920_v3  ;;  %v948_v3 = vld [vmem:[#allocation10 + $0x18] sm:$0xff]  }
  0x48   :  { %814 = vmatprep.subr.bf16.mxu0 %v1087_v0 }
  0x4b   :  { %815 = vmatpush3.bf16.msra.mxu0 %v921_v4  ;;  %v949_v4 = vld [vmem:[#allocation10 + $0x10] sm:$0xff]  }
  0x4c   :  { %816 = vmatprep.subr.bf16.mxu0 %v1087_v0 }
  0x4f   :  { %817 = vmatpush3.bf16.msra.mxu0 %v922_v5  ;;  %v950_v5 = vld [vmem:[#allocation10 + $0x8] sm:$0xff]  }
  0x50   :  { %818 = vmatprep.subr.bf16.mxu0 %v1087_v0 }
  0x53   :  { %819 = vmatpush3.bf16.msra.mxu0 %v923_v6  ;;  %v951_v6 = vld [vmem:[#allocation10] sm:$0xff]  }
  0x54   :  { %820 = vmatprep.subr.bf16.mxu0 %v1087_v0 }
  0x57   :  { %821 = vmatpush3.bf16.msra.mxu0 %v924_v7  ;;  %v755_v7 = vld [vmem:[%s1244_s5 + $0x1] ss:$0 sm:$0xff]  ;;  %s1052_s5 = scalar_lea.vmem %s711_s13, 256 }
  0x58   :  { %822 = vmatprep.subr.bf16.mxu0 %v1087_v0  ;;  %p1053_p11 = scmp.ne.s32.totalorder %s711_s13, %s1052_s5  ;;  %p1058_p13 = scmp.lt.s32.totalorder %s1052_s5, %s1052_s5 }
  0x5a   :  { %p1059_p0 = por %p1058_p13, %p1057_p12 }
  0x5b   :  { %823 = vmatpush3.bf16.msra.mxu0 %v925_v8 }
  0x5c   :  { %880 = vmatprep.subr.bf16.mxu0 %v1087_v0  ;;  %p1060_p1 = pnand %p1059_p0, %p1053_p11 }
  0x5e   :  { %825 = vmatmul.mubr.bf16.vlgmr.msra.gmra.mxu0 %v926_v9 }
  0x5f   :  { %882 = vmatprep.mubr.msk.bf16.mxu0 %vm1088_vm0, %v1087_v0 }
 0x11e   :  { %v206_v10 = vpop.f32.mrf.mxu0 }
 0x120   :  { %v826_v11 = vpop.f32.mrf.mxu0 }
 0x122   :  { %v209_v12 = vpop.f32.mrf.mxu0 }
 0x123   :  { %v215_v13 = vpack.c.bf16 %v209_v12, %v206_v10 }
 0x124   :  { %v827_v14 = vpop.f32.mrf.mxu0 }
 0x125   :  { %829 = vmatpush3.bf16.msra.mxu1 %v215_v13 }
 0x126   :  { %834 = vmatprep.subr.bf16.mxu1 %v1087_v0 }
 0x128   :  { %831 = vmatmul.mubr.msk.bf16.vlgmr.msra.gmra.mxu1 %vm227_vm1, %v1183_v15 }
 0x129   :  { %835 = vmatpush3.bf16.msra.mxu1 %v928_v16  ;;  %850 = vmatprep.mubr.msk.bf16.mxu1 %vm1088_vm0, %v1087_v0 }
 0x12a   :  { %836 = vmatprep.subr.bf16.mxu1 %v1087_v0 }
 0x12d   :  { %837 = vmatpush3.bf16.msra.mxu1 %v929_v17 }
 0x12e   :  { %838 = vmatprep.subr.bf16.mxu1 %v1087_v0 }
 0x131   :  { %839 = vmatpush3.bf16.msra.mxu1 %v930_v18 }
 0x132   :  { %840 = vmatprep.subr.bf16.mxu1 %v1087_v0 }
 0x135   :  { %841 = vmatpush3.bf16.msra.mxu1 %v931_v19 }
 0x136   :  { %842 = vmatprep.subr.bf16.mxu1 %v1087_v0 }
 0x139   :  { %843 = vmatpush3.bf16.msra.mxu1 %v932_v20 }
 0x13a   :  { %844 = vmatprep.subr.bf16.mxu1 %v1087_v0 }
 0x13d   :  { %845 = vmatpush3.bf16.msra.mxu1 %v933_v21 }
 0x13e   :  { %846 = vmatprep.subr.bf16.mxu1 %v1087_v0 }
 0x141   :  { %847 = vmatpush3.bf16.msra.mxu1 %v934_v22 }
 0x142   :  { %848 = vmatprep.subr.bf16.mxu1 %v1087_v0 }
 0x145   :  { %849 = vmatpush3.bf16.msra.mxu1 %v935_v23 }
 0x146   :  { %854 = vmatprep.subr.bf16.mxu1 %v1087_v0 }
 0x1e8   :  { %v265_v25 = vpop.f32.mrf.mxu1 }
 0x1e9   :  { %v266_v27 = vadd.f32 %v733_v24, %v265_v25 }
 0x1ea   :  { %v832_v26 = vpop.f32.mrf.mxu1 }
 0x1eb   :  { %v272_v31 = vmax.f32 %v266_v27, 0.0 }
 0x1ec   :  { %v268_v28 = vpop.f32.mrf.mxu1 }
 0x1ed   :  { %v269_v29 = vadd.f32 %v733_v24, %v268_v28 }
 0x1ee   :  { %v833_v30 = vpop.f32.mrf.mxu1 }
 0x1ef   :  { %v273_v32 = vmax.f32 %v269_v29, 0.0 }
 0x1f1   :  { %v274_v33 = vpack.c.bf16 %v273_v32, %v272_v31 }
 0x1f3   :  { %851 = vmatmul.mubr.bf16.vlgmr.msra.gmra.mxu1 %v274_v33 }
 0x1f4   :  { %856 = vmatprep.mubr.msk.bf16.mxu1 %vm1088_vm0, %v1087_v0 }
 0x2b3   :  { %v374_v34 = vpop.f32.mrf.mxu1 }
 0x2b5   :  { %v852_v35 = vpop.f32.mrf.mxu1 }
 0x2b7   :  { %v377_v36 = vpop.f32.mrf.mxu1 }
 0x2b8   :  { %v381_v37 = vpack.c.bf16 %v377_v36, %v374_v34 }
 0x2b9   :  { %v853_v38 = vpop.f32.mrf.mxu1 }
 0x2ba   :  { %855 = vmatpush3.bf16.msra.mxu1 %v381_v37 }
 0x2bb   :  { %860 = vmatprep.subr.bf16.mxu1 %v1087_v0 }
 0x2bd   :  { %857 = vmatmul.mubr.msk.bf16.vlgmr.msra.gmra.mxu1 %vm227_vm1, %v1183_v15 }
 0x2be   :  { %861 = vmatpush3.bf16.msra.mxu1 %v936_v39  ;;  %876 = vmatprep.mubr.msk.bf16.mxu1 %vm1088_vm0, %v1087_v0 }
 0x2bf   :  { %862 = vmatprep.subr.bf16.mxu1 %v1087_v0 }
 0x2c2   :  { %863 = vmatpush3.bf16.msra.mxu1 %v937_v40 }
 0x2c3   :  { %864 = vmatprep.subr.bf16.mxu1 %v1087_v0 }
 0x2c6   :  { %865 = vmatpush3.bf16.msra.mxu1 %v938_v41 }
 0x2c7   :  { %866 = vmatprep.subr.bf16.mxu1 %v1087_v0 }
 0x2ca   :  { %867 = vmatpush3.bf16.msra.mxu1 %v939_v42 }
 0x2cb   :  { %868 = vmatprep.subr.bf16.mxu1 %v1087_v0 }
 0x2ce   :  { %869 = vmatpush3.bf16.msra.mxu1 %v940_v43 }
 0x2cf   :  { %870 = vmatprep.subr.bf16.mxu1 %v1087_v0 }
 0x2d2   :  { %871 = vmatpush3.bf16.msra.mxu1 %v941_v44 }
 0x2d3   :  { %872 = vmatprep.subr.bf16.mxu1 %v1087_v0 }
 0x2d6   :  { %873 = vmatpush3.bf16.msra.mxu1 %v942_v45 }
 0x2d7   :  { %874 = vmatprep.subr.bf16.mxu1 %v1087_v0 }
 0x2da   :  { %875 = vmatpush3.bf16.msra.mxu1 %v943_v46 }
 0x37d   :  { %v422_v48 = vpop.f32.mrf.mxu1 }
 0x37e   :  { %v423_v50 = vadd.f32 %v744_v47, %v422_v48 }
 0x37f   :  { %v858_v49 = vpop.f32.mrf.mxu1 }
 0x380   :  { %v429_v54 = vmax.f32 %v423_v50, 0.0 }
 0x381   :  { %v425_v51 = vpop.f32.mrf.mxu1 }
 0x382   :  { %v426_v52 = vadd.f32 %v744_v47, %v425_v51 }
 0x383   :  { %v859_v53 = vpop.f32.mrf.mxu1 }
 0x384   :  { %v430_v55 = vmax.f32 %v426_v52, 0.0 }
 0x386   :  { %v431_v56 = vpack.c.bf16 %v430_v55, %v429_v54 }
 0x388   :  { %877 = vmatmul.mubr.bf16.vlgmr.msra.gmra.mxu1 %v431_v56 }
 0x448   :  { %v533_v57 = vpop.f32.mrf.mxu1 }
 0x44a   :  { %v878_v58 = vpop.f32.mrf.mxu1 }
 0x44c   :  { %v536_v59 = vpop.f32.mrf.mxu1 }
 0x44d   :  { %v540_v60 = vpack.c.bf16 %v536_v59, %v533_v57 }
 0x44e   :  { %v879_v61 = vpop.f32.mrf.mxu1 }
 0x44f   :  { %881 = vmatpush3.bf16.msra.mxu0 %v540_v60 }
 0x450   :  { %886 = vmatprep.subr.bf16.mxu0 %v1087_v0 }
 0x452   :  { %883 = vmatmul.mubr.msk.bf16.vlgmr.msra.gmra.mxu0 %vm227_vm1, %v1183_v15 }
 0x453   :  { %887 = vmatpush3.bf16.msra.mxu0 %v944_v62  ;;  %902 = vmatprep.mubr.msk.bf16.mxu0 %vm1088_vm0, %v1087_v0 }
 0x454   :  { %888 = vmatprep.subr.bf16.mxu0 %v1087_v0 }
 0x457   :  { %889 = vmatpush3.bf16.msra.mxu0 %v945_v63 }
 0x458   :  { %890 = vmatprep.subr.bf16.mxu0 %v1087_v0 }
 0x45b   :  { %891 = vmatpush3.bf16.msra.mxu0 %v946_v1 }
 0x45c   :  { %892 = vmatprep.subr.bf16.mxu0 %v1087_v0 }
 0x45f   :  { %893 = vmatpush3.bf16.msra.mxu0 %v947_v2 }
 0x460   :  { %894 = vmatprep.subr.bf16.mxu0 %v1087_v0 }
 0x463   :  { %895 = vmatpush3.bf16.msra.mxu0 %v948_v3 }
 0x464   :  { %896 = vmatprep.subr.bf16.mxu0 %v1087_v0 }
 0x467   :  { %897 = vmatpush3.bf16.msra.mxu0 %v949_v4 }
 0x468   :  { %898 = vmatprep.subr.bf16.mxu0 %v1087_v0 }
 0x46b   :  { %899 = vmatpush3.bf16.msra.mxu0 %v950_v5 }
 0x46c   :  { %900 = vmatprep.subr.bf16.mxu0 %v1087_v0  ;;  %v757_v0 = vld [vmem:[%s1246_s7] ss:$0 sm:$0xff] }
 0x46f   :  { %901 = vmatpush3.bf16.msra.mxu0 %v951_v6 }
 0x512   :  { %v581_v8 = vpop.f32.mrf.mxu0 }
 0x513   :  { %v582_v10 = vadd.f32 %v755_v7, %v581_v8 }
 0x514   :  { %v884_v9 = vpop.f32.mrf.mxu0 }
 0x515   :  { %v588_v14 = vmax.f32 %v582_v10, 0.0 }
 0x516   :  { %v584_v11 = vpop.f32.mrf.mxu0 }
 0x517   :  { %v585_v12 = vadd.f32 %v755_v7, %v584_v11 }
 0x518   :  { %v885_v13 = vpop.f32.mrf.mxu0 }
 0x519   :  { %v589_v15 = vmax.f32 %v585_v12, 0.0 }
 0x51b   :  { %v590_v16 = vpack.c.bf16 %v589_v15, %v588_v14 }
 0x51d   :  { %903 = vmatmul.mubr.bf16.vlgmr.msra.gmra.mxu0 %v590_v16 }
 0x5dd   :  { %v696_v17 = vpop.f32.mrf.mxu0 }
 0x5de   :  { %v697_v18 = vadd.f32 %v757_v0, %v696_v17 }
 0x5df   :  { %v904_v19 = vpop.f32.mrf.mxu0 }
 0x5e0   :  { %703 = vst [vmem:[#allocation11] sm:$0xff] %v697_v18 }
 0x5e1   :  { %v699_v20 = vpop.f32.mrf.mxu0 }
 0x5e2   :  { %v700_v21 = vadd.f32 %v757_v0, %v699_v20 }
 0x5e3   :  { %v905_v22 = vpop.f32.mrf.mxu0 }
 0x5e4   :  { %704 = vst [vmem:[#allocation11 + $0x8] sm:$0xff] %v700_v21 }
 0x5e5   :  { %1063 = shalt.err (!%p1060_p1)
}
 0x5e6   :  { %s1090_s14 = smov 128   ;;  %s1091_s7 = smov 8  }
 0x5e7   :  { %716 = dma.vmem_to_hbm [thread:$0]  %s711_s13, 256, %s1247_s8, [#allocation4], %s1090_s14, %s1090_s14, %s1091_s7  }
 0x5e8   :  { %1078 = dma.done.wait [#allocation4], 256  }
 0x5e9   :  { %1079 = vsyncadd [#allocation4], 4294967040 }
 0x5ea   :  { %720 = vsyncpa [#allocation3], 1 }
 0x5eb   :  { %721 = vsyncpa [#allocation6], 1 }
 0x5ec   :  { %722 = vsyncpa [#allocation9], 1 }
 0x5ed   :  { %723 = vsyncpa [#allocation4], 1 }

</bundles_post_ra>
